<compile_context>
chip_gen: v5e
topology: v5e:2x2
jax: 0.10.0
libtpu: 0.0.40
codegen_flags: <defaults>
</compile_context>

<pallas_src>
import functools

import jax
import jax.numpy as jnp
from jax.experimental import pallas as pl
from jax.experimental.pallas import tpu as pltpu


def _round_up(v, m):
    return (v + m - 1) // m * m


def _adapter_kernel(x_ref, w_ref, b_ref, g_ref, beta_ref, o_ref, *, n_real, eps):
    # x_ref: (TM, K), w_ref: (K, Np), b/g/beta: (1, Np), o_ref: (TM, Np)
    # Matmul in native input dtype; MXU accumulates in f32.
    y = jnp.dot(x_ref[...], w_ref[...], preferred_element_type=jnp.float32)
    y = y + b_ref[...].astype(jnp.float32)

    # One-pass LayerNorm statistics.  Padded feature columns of y are exactly
    # zero (zero weight columns + zero bias), so summing over the padded lane
    # axis and dividing by the *real* feature count gives exact stats.
    inv_n = jnp.float32(1.0 / n_real)
    s1 = jnp.sum(y, axis=-1, keepdims=True)
    s2 = jnp.sum(y * y, axis=-1, keepdims=True)
    mean = s1 * inv_n
    var = s2 * inv_n - mean * mean
    inv_std = jax.lax.rsqrt(var + eps)

    # Padded gamma/beta columns are zero => padded output columns are zero.
    out = (y - mean) * inv_std * g_ref[...].astype(jnp.float32) \
          + beta_ref[...].astype(jnp.float32)
    o_ref[...] = out.astype(o_ref.dtype)


def adapter_forward(x, w, b, gamma, beta, *, eps=1e-5, block_m=None,
                    vmem_limit_bytes=32 * 1024 * 1024):
    """x: (B, S, in_features); w: (in, out); b/gamma/beta: (out,)."""
    B, S, K = x.shape
    Kw, N = w.shape
    assert Kw == K
    M = B * S
    dtype = x.dtype
    itemsize = jnp.dtype(dtype).itemsize

    # Lane-dense feature axis.
    N_pad = _round_up(N, 128)

    # Sublane granularity for the row tile (8 for f32, 16 for packed dtypes).
    sub = 8 if itemsize >= 4 else 16

    if block_m is None:
        # Budget double-buffered x/out tiles + resident weight against ~20 MiB
        # so we stay inside v7x's 32 MiB scoped-VMEM default (64 MiB physical)
        # while still getting large, pipelined tiles.
        budget = 20 * 1024 * 1024
        fixed = K * N_pad * itemsize + 3 * N_pad * 4
        per_row = 2 * K * itemsize + 2 * N_pad * itemsize
        block_m = int(max(sub, min(512, (budget - fixed) // max(per_row, 1))))
    # Never tile past the (sublane-rounded) problem size; keep it a multiple
    # of the sublane granularity.
    block_m = max(sub, (min(block_m, _round_up(M, sub)) // sub) * sub)
    M_pad = _round_up(M, block_m)

    # Wrapper-side zero padding so every tile is full-sized.
    x2 = x.reshape(M, K)
    if M_pad != M:
        x2 = jnp.pad(x2, ((0, M_pad - M), (0, 0)))
    if N_pad != N:
        w_p = jnp.pad(w, ((0, 0), (0, N_pad - N)))
        b_p = jnp.pad(b, (0, N_pad - N))
        g_p = jnp.pad(gamma, (0, N_pad - N))
        be_p = jnp.pad(beta, (0, N_pad - N))
    else:
        w_p, b_p, g_p, be_p = w, b, gamma, beta
    b_p = b_p.reshape(1, N_pad)
    g_p = g_p.reshape(1, N_pad)
    be_p = be_p.reshape(1, N_pad)

    grid = (M_pad // block_m,)
    kernel = functools.partial(_adapter_kernel, n_real=N, eps=eps)

    out = pl.pallas_call(
        kernel,
        out_shape=jax.ShapeDtypeStruct((M_pad, N_pad), dtype),
        grid=grid,
        in_specs=[
            pl.BlockSpec((block_m, K), lambda i: (i, 0)),    # x row tile (pipelined)
            pl.BlockSpec((K, N_pad), lambda i: (0, 0)),      # weight (constant -> resident)
            pl.BlockSpec((1, N_pad), lambda i: (0, 0)),      # bias
            pl.BlockSpec((1, N_pad), lambda i: (0, 0)),      # LN gamma
            pl.BlockSpec((1, N_pad), lambda i: (0, 0)),      # LN beta
        ],
        out_specs=pl.BlockSpec((block_m, N_pad), lambda i: (i, 0)),
        compiler_params=pltpu.CompilerParams(
            dimension_semantics=("parallel",),
            vmem_limit_bytes=vmem_limit_bytes,
        ),
    )(x2, w_p, b_p, g_p, be_p)

    out = out[:M, :N]
    return out.reshape(B, S, N)


def adapter_reference(x, w, b, gamma, beta, eps=1e-5):
    y = jnp.einsum("bsk,kn->bsn", x, w) + b
    mean = jnp.mean(y, axis=-1, keepdims=True)
    var = jnp.mean((y - mean) ** 2, axis=-1, keepdims=True)
    return ((y - mean) * jax.lax.rsqrt(var + eps)) * gamma + beta


if __name__ == "__main__":
    key = jax.random.PRNGKey(0)
    B, S, in_features, out_features = 2, 8, 32, 64

    k_x, k_w, k_b = jax.random.split(key, 3)
    x = jax.random.normal(k_x, (B, S, in_features), dtype=jnp.float32)

    # Deterministic parameter init (mimicking nn.Linear uniform init bounds).
    bound = 1.0 / (in_features ** 0.5)
    w = jax.random.uniform(k_w, (in_features, out_features),
                           minval=-bound, maxval=bound, dtype=jnp.float32)
    b = jax.random.uniform(k_b, (out_features,),
                           minval=-bound, maxval=bound, dtype=jnp.float32)
    gamma = jnp.ones((out_features,), dtype=jnp.float32)   # LayerNorm weight
    beta = jnp.zeros((out_features,), dtype=jnp.float32)   # LayerNorm bias

    out = adapter_forward(x, w, b, gamma, beta)
    out = jax.block_until_ready(out)

    ref = adapter_reference(x, w, b, gamma, beta)
    assert out.shape == (B, S, out_features)
    assert jnp.allclose(out, ref, atol=1e-4, rtol=1e-4), \
        float(jnp.max(jnp.abs(out - ref)))

    print("KERNEL_OK")
</pallas_src>

<mosaic_0001>
module attributes {stable_mosaic.version = 11 : i64} {
  func.func @_adapter_kernel(%arg0: i32, %arg1: memref<16x32xf32, #tpu.memory_space<vmem>>, %arg2: memref<32x128xf32, #tpu.memory_space<vmem>>, %arg3: memref<1x128xf32, #tpu.memory_space<vmem>>, %arg4: memref<1x128xf32, #tpu.memory_space<vmem>>, %arg5: memref<1x128xf32, #tpu.memory_space<vmem>>, %arg6: memref<16x128xf32, #tpu.memory_space<vmem>>) attributes {dimension_semantics = [#tpu.dimension_semantics<parallel>], iteration_bounds = array<i64: 1>, scalar_prefetch = 0 : i64, scratch_operands = 0 : i64, tpu.core_type = #tpu.core_type<tc>, window_params = [{transform_indices = @transform_0, window_bounds = array<i64: 16, 32>}, {pipeline_mode = #tpu.pipeline_mode<synchronous>, transform_indices = @transform_1, window_bounds = array<i64: 32, 128>}, {pipeline_mode = #tpu.pipeline_mode<synchronous>, transform_indices = @transform_2, window_bounds = array<i64: 1, 128>}, {pipeline_mode = #tpu.pipeline_mode<synchronous>, transform_indices = @transform_3, window_bounds = array<i64: 1, 128>}, {pipeline_mode = #tpu.pipeline_mode<synchronous>, transform_indices = @transform_4, window_bounds = array<i64: 1, 128>}, {transform_indices = @transform_5, window_bounds = array<i64: 16, 128>}]} {
    %c0 = arith.constant 0 : index
    %c0_0 = arith.constant 0 : index
    %0 = vector.load %arg1[%c0, %c0_0] : memref<16x32xf32, #tpu.memory_space<vmem>>, vector<16x32xf32>
    %c0_1 = arith.constant 0 : index
    %c0_2 = arith.constant 0 : index
    %1 = vector.load %arg2[%c0_1, %c0_2] : memref<32x128xf32, #tpu.memory_space<vmem>>, vector<32x128xf32>
    %cst = arith.constant dense<0.000000e+00> : vector<16x128xf32>
    %2 = tpu.matmul %0, %1, %cst {dimension_numbers = #tpu.dot_dimension_numbers<[1], [0], [0], [1], [0, 0, 1, 1], [], []>} : vector<16x32xf32>, vector<32x128xf32>, vector<16x128xf32> -> vector<16x128xf32>
    %c0_3 = arith.constant 0 : index
    %c0_4 = arith.constant 0 : index
    %3 = vector.load %arg3[%c0_3, %c0_4] : memref<1x128xf32, #tpu.memory_space<vmem>>, vector<1x128xf32>
    %4 = vector.broadcast %3 : vector<1x128xf32> to vector<16x128xf32>
    %5 = arith.addf %2, %4 : vector<16x128xf32>
    %cst_5 = arith.constant dense<0.000000e+00> : vector<16xf32>
    %6 = vector.multi_reduction <add>, %5, %cst_5 [1] : vector<16x128xf32> to vector<16xf32>
    %7 = vector.shape_cast %6 : vector<16xf32> to vector<16x1xf32>
    %8 = arith.mulf %5, %5 : vector<16x128xf32>
    %cst_6 = arith.constant dense<0.000000e+00> : vector<16xf32>
    %9 = vector.multi_reduction <add>, %8, %cst_6 [1] : vector<16x128xf32> to vector<16xf32>
    %10 = vector.shape_cast %9 : vector<16xf32> to vector<16x1xf32>
    %cst_7 = arith.constant 1.562500e-02 : f32
    %11 = vector.broadcast %cst_7 : f32 to vector<16x1xf32>
    %12 = arith.mulf %7, %11 : vector<16x1xf32>
    %cst_8 = arith.constant 1.562500e-02 : f32
    %13 = vector.broadcast %cst_8 : f32 to vector<16x1xf32>
    %14 = arith.mulf %10, %13 : vector<16x1xf32>
    %15 = arith.mulf %12, %12 : vector<16x1xf32>
    %16 = arith.subf %14, %15 : vector<16x1xf32>
    %cst_9 = arith.constant 9.99999974E-6 : f32
    %17 = vector.broadcast %cst_9 : f32 to vector<16x1xf32>
    %18 = arith.addf %16, %17 : vector<16x1xf32>
    %19 = math.rsqrt %18 : vector<16x1xf32>
    %20 = vector.broadcast %12 : vector<16x1xf32> to vector<16x128xf32>
    %21 = arith.subf %5, %20 : vector<16x128xf32>
    %22 = vector.broadcast %19 : vector<16x1xf32> to vector<16x128xf32>
    %23 = arith.mulf %21, %22 : vector<16x128xf32>
    %c0_10 = arith.constant 0 : index
    %c0_11 = arith.constant 0 : index
    %24 = vector.load %arg4[%c0_10, %c0_11] : memref<1x128xf32, #tpu.memory_space<vmem>>, vector<1x128xf32>
    %25 = vector.broadcast %24 : vector<1x128xf32> to vector<16x128xf32>
    %26 = arith.mulf %23, %25 : vector<16x128xf32>
    %c0_12 = arith.constant 0 : index
    %c0_13 = arith.constant 0 : index
    %27 = vector.load %arg5[%c0_12, %c0_13] : memref<1x128xf32, #tpu.memory_space<vmem>>, vector<1x128xf32>
    %28 = vector.broadcast %27 : vector<1x128xf32> to vector<16x128xf32>
    %29 = arith.addf %26, %28 : vector<16x128xf32>
    %c0_14 = arith.constant 0 : index
    %c0_15 = arith.constant 0 : index
    %30 = vector.load %arg6[%c0_14, %c0_15] : memref<16x128xf32, #tpu.memory_space<vmem>>, vector<16x128xf32>
    tpu.vector_store %arg6[%c0_14, %c0_15], %29 {strides = array<i32>} : memref<16x128xf32, #tpu.memory_space<vmem>>, vector<16x128xf32>,
    return
  }
  func.func @transform_0(%arg0: i32) -> (i32, i32) {
    %c0_i32 = arith.constant 0 : i32
    %c0_i32_0 = arith.constant 0 : i32
    return %arg0, %c0_i32 : i32, i32
  }
  func.func @transform_1(%arg0: i32) -> (i32, i32) {
    %c0_i32 = arith.constant 0 : i32
    %c0_i32_0 = arith.constant 0 : i32
    %c0_i32_1 = arith.constant 0 : i32
    return %c0_i32, %c0_i32_0 : i32, i32
  }
  func.func @transform_2(%arg0: i32) -> (i32, i32) {
    %c0_i32 = arith.constant 0 : i32
    %c0_i32_0 = arith.constant 0 : i32
    %c0_i32_1 = arith.constant 0 : i32
    return %c0_i32, %c0_i32_0 : i32, i32
  }
  func.func @transform_3(%arg0: i32) -> (i32, i32) {
    %c0_i32 = arith.constant 0 : i32
    %c0_i32_0 = arith.constant 0 : i32
    %c0_i32_1 = arith.constant 0 : i32
    return %c0_i32, %c0_i32_0 : i32, i32
  }
  func.func @transform_4(%arg0: i32) -> (i32, i32) {
    %c0_i32 = arith.constant 0 : i32
    %c0_i32_0 = arith.constant 0 : i32
    %c0_i32_1 = arith.constant 0 : i32
    return %c0_i32, %c0_i32_0 : i32, i32
  }
  func.func @transform_5(%arg0: i32) -> (i32, i32) {
    %c0_i32 = arith.constant 0 : i32
    %c0_i32_0 = arith.constant 0 : i32
    return %arg0, %c0_i32 : i32, i32
  }
}

</mosaic_0001>

<bundles_post_ra>
// kernel: tpu_custom_call.1
= control target key start
LH: loop header
LB: loop body
LE: loop exit
PB: predicated region body
PF: predicated region fallthrough
CT: control target
= control target key end

     0   :  { %10 = vsyncpa [#allocation3], 0  ;;  %s329_s0 = inlined_call_operand.hbm [shape: f32[16,32], index: 0, kind: input, shape index: {}]   ;;  %s330_s1 = inlined_call_operand.hbm [shape: f32[32,128], index: 1, kind: input, shape index: {}]   ;;  %s331_s2 = inlined_call_operand.vmem [shape: f32[1,128], index: 2, kind: input, shape index: {}]   ;;  %s332_s3 = inlined_call_operand.vmem [shape: f32[1,128], index: 3, kind: input, shape index: {}]   ;;  %s333_s4 = inlined_call_operand.vmem [shape: f32[1,128], index: 4, kind: input, shape index: {}]   ;;  %s334_s5 = inlined_call_operand.hbm [shape: f32[16,128], index: 5, kind: output, shape index: {}]  }
   0x1   :  { %11 = vsyncpa [#allocation6], 0 }
   0x2   :  { %12 = vsyncpa [#allocation4], 0  ;;  %s17_s20 = sshll.u32 %s329_s0, 4  ;;  %s267_s21 = smov [#allocation2]   ;;  %s18_s20 = int_to_ptr.hbm [resolvable:$true] %s17_s20 }
   0x3   :  { %s19_s22 = sshll.u32 %s267_s21, 4  ;;  %s30_s25 = sshll.u32 %s330_s1, 4  ;;  %s20_s22 = int_to_ptr.vmem [resolvable:$true] %s19_s22  ;;  %s31_s25 = int_to_ptr.hbm [resolvable:$true] %s30_s25 }
   0x4   :  { %s268_s26 = smov 128   ;;  %s269_s27 = smov 8  }
   0x5   :  { %25 = dma.hbm_to_vmem [thread:$0]  %s18_s20, 256, %s20_s22, [#allocation3], %s268_s26, %s268_s26, %s269_s27  }
   0x6   :  { %s270_s28 = smov [#allocation5]  }
   0x7   :  { %s32_s29 = sshll.u32 %s270_s28, 4  ;;  %s33_s29 = int_to_ptr.vmem [resolvable:$true] %s32_s29 }
   0x8   :  { %38 = dma.hbm_to_vmem [thread:$0]  %s31_s25, 512, %s33_s29, [#allocation6], %s268_s26, %s268_s26, %s269_s27  }
   0x9   :  { %261 = dma.done.wait [#allocation3], 256  }
   0xa   :  { %262 = vsyncadd [#allocation3], 4294967040 }
   0xb   :  { %263 = dma.done.wait [#allocation6], 512  }
   0xc   :  { %264 = vsyncadd [#allocation6], 4294966784  ;;  %v58_v0 = vld [vmem:[#allocation5 + $0x18] sm:$0xff]  ;;  %v57_v1 = vld [vmem:[#allocation5 + $0x10] sm:$0xff]  ;;  %vm63_vm0 = vcmask 261120   ;;  %s157_s11 = sshll.u32 %s334_s5, 4  ;;  %s158_s11 = int_to_ptr.hbm [resolvable:$true] %s157_s11 }
   0xd   :  { %82 = vmatpush.msra.mxu0 %v58_v0  ;;  %173 = vmatpush.msra.mxu1 %v58_v0  ;;  %v56_v2 = vld [vmem:[#allocation5 + $0x8] sm:$0xff]  ;;  %v55_v3 = vld [vmem:[#allocation5] sm:$0xff]  ;;  %v53_v4 = vld [vmem:[#allocation2] sm:$0xff] }
   0xe   :  { %v54_v5 = vld [vmem:[#allocation2 + $0x8] sm:$0xff]  ;;  %v182_v6 = vld [vmem:[%s331_s2] ss:$0 sm:$0xff] }
   0xf   :  { %83 = vmatpush.msra.mxu0 %v57_v1  ;;  %174 = vmatpush.msra.mxu1 %v57_v1  ;;  %v183_v36 = vld [vmem:[%s332_s3] ss:$0 sm:$0xff]  ;;  %s271_s3 = smov [#allocation7]  }
  0x10   :  { %v184_v40 = vld [vmem:[%s333_s4] ss:$0 sm:$0xff]  ;;  %s155_s8 = sshll.u32 %s271_s3, 4  ;;  %s156_s8 = int_to_ptr.vmem [resolvable:$true] %s155_s8 }
  0x11   :  { %84 = vmatpush.msra.mxu0 %v56_v2  ;;  %175 = vmatpush.msra.mxu1 %v56_v2 }
  0x13   :  { %85 = vmatpush.msra.mxu0 %v55_v3  ;;  %176 = vmatpush.msra.mxu1 %v55_v3 }
  0x14   :  { %171 = vmatmul.msk.f32.vlgmr.msra.gmra.mxu0 %vm63_vm0, %v53_v4  ;;  %172 = vmatmul.msk.f32.vlgmr.msra.gmra.mxu1 %vm63_vm0, %v54_v5 }
  0x91   :  { %v87_v7 = vpop.f32.mrf.mxu0  ;;  %v90_v9 = vpop.f32.mrf.mxu1 }
  0x92   :  { %v88_v8 = vadd.f32 %v182_v6, %v87_v7  ;;  %v91_v11 = vadd.f32 %v182_v6, %v90_v9 }
  0x94   :  { %93 = vadd.xlane.f32.xlu0 %v88_v8  ;;  %v97_v10 = vmul.f32 %v88_v8, %v88_v8  ;;  %v98_v12 = vmul.f32 %v91_v11, %v91_v11 }
  0x96   :  { %99 = vadd.xlane.f32.xlu1 %v97_v10 }
  0x9c   :  { %95 = vadd.xlane.f32.xlu0 %v91_v11 }
  0x9e   :  { %101 = vadd.xlane.f32.xlu1 %v98_v12 }
 0x107   :  { %v94_v13 = vpop.xlane.xlu0 %93 }
 0x108   :  { %v103_v14 = vmul.f32 0.015625, %v94_v13 }
 0x109   :  { %v100_v15 = vpop.xlane.xlu1 %99 }
 0x10a   :  { %v107_v16 = vmul.f32 %v103_v14, %v103_v14  ;;  %v105_v17 = vmul.f32 0.015625, %v100_v15  ;;  %v133_v35 = vsub.f32 %v88_v8, %v103_v14 }
 0x10c   :  { %v109_v18 = vsub.f32 %v105_v17, %v107_v16 }
 0x10e   :  { %v111_v19 = vadd.f32 1e-05, %v109_v18 }
 0x10f   :  { %v96_v20 = vpop.xlane.xlu0 %95 }
 0x110   :  { %185 = vrsqrt.f32 %v111_v19  ;;  %v104_v21 = vmul.f32 0.015625, %v96_v20  ;;  %vm119_vm2 = vweird.f32 %v111_v19 }
 0x111   :  { %v102_v22 = vpop.xlane.xlu1 %101 }
 0x112   :  { %v108_v23 = vmul.f32 %v104_v21, %v104_v21  ;;  %v106_v24 = vmul.f32 0.015625, %v102_v22  ;;  %v134_v46 = vsub.f32 %v91_v11, %v104_v21 }
 0x114   :  { %v110_v25 = vsub.f32 %v106_v24, %v108_v23 }
 0x116   :  { %v186_v26 = vpop.eup %185  ;;  %v112_v27 = vadd.f32 1e-05, %v110_v25 }
 0x117   :  { %v114_v28 = vmul.f32 %v186_v26, %v111_v19  ;;  %vm120_vm1 = vweird.f32 %v186_v26 }
 0x118   :  { %187 = vrsqrt.f32 %v112_v27  ;;  %vm121_vm3 = vmor %vm119_vm2, %vm120_vm1  ;;  %vm129_vm5 = vweird.f32 %v112_v27 }
 0x119   :  { %v115_v29 = vmul.f32 %v186_v26, %v114_v28 }
 0x11b   :  { %v116_v30 = vmul.f32 0.5, %v115_v29 }
 0x11d   :  { %v117_v31 = vsub.f32 1.5, %v116_v30 }
 0x11e   :  { %v188_v32 = vpop.eup %187 }
 0x11f   :  { %v118_v33 = vmul.f32 %v186_v26, %v117_v31  ;;  %v124_v34 = vmul.f32 %v188_v32, %v112_v27  ;;  %vm130_vm4 = vweird.f32 %v188_v32 }
 0x120   :  { %vm131_vm6 = vmor %vm129_vm5, %vm130_vm4 }
 0x121   :  { %v122_v37 = vsel %vm121_vm3, %v186_v26, %v118_v33  ;;  %v125_v38 = vmul.f32 %v188_v32, %v124_v34 }
 0x122   :  { %v135_v39 = vmul.f32 %v133_v35, %v122_v37 }
 0x123   :  { %v126_v41 = vmul.f32 0.5, %v125_v38 }
 0x124   :  { %v141_v42 = vmul.f32 %v183_v36, %v135_v39 }
 0x125   :  { %v127_v43 = vsub.f32 1.5, %v126_v41 }
 0x126   :  { %v147_v44 = vadd.f32 %v184_v40, %v141_v42 }
 0x127   :  { %v128_v45 = vmul.f32 %v188_v32, %v127_v43 }
 0x128   :  { %149 = vst [vmem:[#allocation7] sm:$0xff] %v147_v44 }
 0x129   :  { %v132_v47 = vsel %vm131_vm6, %v188_v32, %v128_v45 }
 0x12a   :  { %v136_v48 = vmul.f32 %v134_v46, %v132_v47 }
 0x12c   :  { %v142_v49 = vmul.f32 %v183_v36, %v136_v48 }
 0x12e   :  { %v148_v50 = vadd.f32 %v184_v40, %v142_v49 }
 0x130   :  { %150 = vst [vmem:[#allocation7 + $0x8] sm:$0xff] %v148_v50 }
 0x131   :  { %163 = dma.vmem_to_hbm [thread:$0]  %s156_s8, 256, %s158_s11, [#allocation4], %s268_s26, %s268_s26, %s269_s27  }
 0x132   :  { %265 = dma.done.wait [#allocation4], 256  }
 0x133   :  { %266 = vsyncadd [#allocation4], 4294967040 }
 0x134   :  { %168 = vsyncpa [#allocation3], 1 }
 0x135   :  { %169 = vsyncpa [#allocation6], 1 }
 0x136   :  { %170 = vsyncpa [#allocation4], 1 }

</bundles_post_ra>
